<compile_context>
chip_gen: v7x
topology: tpu7x:2x2x1
jax: 0.10.0
libtpu: 0.0.40
codegen_flags: <defaults>
</compile_context>

<pallas_src>
import functools

import numpy as np
import jax
import jax.numpy as jnp
from jax.experimental import pallas as pl
from jax.experimental.pallas import tpu as pltpu


def _silu(v):
    # Exact SiLU in f32. exp(-v) can overflow to +inf for very negative v, but then
    # 1/(1+inf) == 0 and v*0 == 0, which is the correct limit (v is always finite here).
    return v * (1.0 / (1.0 + jnp.exp(-v)))


def _spp_kernel(x_ref, w1_ref, b1_ref, w2_ref, b2_ref, madd_ref, o_ref, *,
                W, HW, stage_qs, mask_idx):
    f32 = jnp.float32
    bf16 = jnp.bfloat16

    # ---- cv1: 1x1 conv (BN folded) + SiLU, channels on sublanes / HW on lanes --------
    x = x_ref[...].astype(bf16)                                   # (C1, HW)
    y = jnp.dot(w1_ref[...], x, preferred_element_type=f32) + b1_ref[...]
    y = _silu(y)                                                  # (CM, HW) f32

    madd = madd_ref[...]                                          # (n_masks, HW) 0 / -inf

    def tap(v, flat_shift, mrow):
        # v shifted by `flat_shift` flat positions; out-of-image taps forced to -inf via a
        # precomputed additive mask, so the circular wrap of the roll is harmless.
        s = pltpu.roll(v, shift=(-flat_shift) % HW, axis=1)       # XLU lane rotation
        return s + madd[mrow:mrow + 1, :]

    # ---- cv2 partial sums; branch 0 is the identity branch ---------------------------
    acc = jnp.dot(w2_ref[0], y.astype(bf16), preferred_element_type=f32)

    # ---- SPPF cascade of separable stride-1 'same' max pools -------------------------
    cur = y
    for bi, q in enumerate(stage_qs):
        rm = cur                                                  # W pass
        for d in range(-q, q + 1):
            if d == 0:
                continue
            rm = jnp.maximum(rm, tap(cur, d, mask_idx[('w', d)]))
        nxt = rm                                                  # H pass
        for d in range(-q, q + 1):
            if d == 0:
                continue
            nxt = jnp.maximum(nxt, tap(rm, d * W, mask_idx[('h', d)]))
        cur = nxt
        acc = acc + jnp.dot(w2_ref[bi + 1], cur.astype(bf16), preferred_element_type=f32)

    out = _silu(acc + b2_ref[...])                                # (C2, HW)
    o_ref[...] = out.astype(o_ref.dtype)


def _fold_bn_1x1(w, gamma, beta, mean, var, eps=1e-5):
    """Fold inference BatchNorm into a 1x1 conv: returns (Cout, Cin) weight, (Cout,) bias."""
    cout, cin = w.shape[0], w.shape[1]
    scale = (gamma / jnp.sqrt(var + eps)).astype(jnp.float32)
    w_eff = w.reshape(cout, cin).astype(jnp.float32) * scale[:, None]
    b_eff = beta.astype(jnp.float32) - mean.astype(jnp.float32) * scale
    return w_eff, b_eff


def _vmem_limit_bytes(C1, CM, C2, HW, nb, n_masks):
    f32, bf16 = 4, 2
    io = 2 * (C1 + C2) * HW * f32                                    # double-buffered in/out
    wts = 2 * ((CM * C1 + nb * C2 * CM) * bf16 + (CM + C2) * f32 + n_masks * HW * f32)
    live = (4 * CM + 2 * C2) * HW * f32                              # y/cur/rm + acc temporaries
    return int(min(max(2 * (io + wts + live), 16 * 2**20), 64 * 2**20))


def spp(x, w1, bn1, w2, bn2, pool_ks=(5, 9, 13)):
    """Pallas TPU SPP forward. x: (B, C1, H, W) NCHW; returns (B, C2, H, W)."""
    B, C1, H, W = x.shape
    CM = w1.shape[0]                      # hidden channels c_ = C1 // 2
    C2 = w2.shape[0]
    nb = len(pool_ks) + 1
    assert w2.shape[1] == nb * CM
    HW = H * W

    # SPPF cascade decomposition: k_i = a_i ∘ k_{i-1} with a_i = k_i - k_{i-1} + 1.
    stage_qs, k_prev = [], 1
    for k in pool_ks:
        a = k - k_prev + 1
        assert a >= 1 and a % 2 == 1, "pool kernels must be odd, increasing, same parity"
        stage_qs.append(a // 2)
        k_prev = k

    # Fold BN (f32) then cast weights to bf16 for the native MXU path.
    w1f, b1f = _fold_bn_1x1(w1, *bn1)                         # (CM, C1), (CM,)
    w2f, b2f = _fold_bn_1x1(w2, *bn2)                         # (C2, nb*CM), (C2,)
    w1e = w1f.astype(jnp.bfloat16)
    w2e = jnp.transpose(w2f.reshape(C2, nb, CM), (1, 0, 2)).astype(jnp.bfloat16)  # (nb,C2,CM)
    b1e = b1f.reshape(CM, 1)
    b2e = b2f.reshape(C2, 1)

    # Additive -inf edge masks for the rolled max-pool taps (host-built trace-time constants).
    col = np.arange(HW, dtype=np.int64) % W
    row = np.arange(HW, dtype=np.int64) // W
    offs = sorted({d for q in stage_qs for d in range(-q, q + 1) if d != 0})
    mask_idx, rows = {}, []
    for d in offs:
        mask_idx[('w', d)] = len(rows)
        rows.append(np.where((col + d >= 0) & (col + d < W), 0.0, -np.inf))
        mask_idx[('h', d)] = len(rows)
        rows.append(np.where((row + d >= 0) & (row + d < H), 0.0, -np.inf))
    if not rows:
        rows.append(np.zeros(HW))
    madd = jnp.asarray(np.stack(rows).astype(np.float32))     # (n_masks, HW)
    n_masks = madd.shape[0]

    x2 = x.reshape(B, C1, HW)                                 # free reshape, no HBM round trip

    kernel = functools.partial(_spp_kernel, W=W, HW=HW,
                               stage_qs=tuple(stage_qs), mask_idx=mask_idx)
    out = pl.pallas_call(
        kernel,
        out_shape=jax.ShapeDtypeStruct((B, C2, HW), x.dtype),
        grid_spec=pltpu.PrefetchScalarGridSpec(
            num_scalar_prefetch=0,
            grid=(B,),
            in_specs=[
                pl.BlockSpec((None, C1, HW), lambda b: (b, 0, 0)),
                pl.BlockSpec((CM, C1), lambda b: (0, 0)),
                pl.BlockSpec((CM, 1), lambda b: (0, 0)),
                pl.BlockSpec((nb, C2, CM), lambda b: (0, 0, 0)),
                pl.BlockSpec((C2, 1), lambda b: (0, 0)),
                pl.BlockSpec((n_masks, HW), lambda b: (0, 0)),
            ],
            out_specs=pl.BlockSpec((None, C2, HW), lambda b: (b, 0, 0)),
        ),
        compiler_params=pltpu.CompilerParams(
            dimension_semantics=("parallel",),
            vmem_limit_bytes=_vmem_limit_bytes(C1, CM, C2, HW, nb, n_masks)),
    )(x2, w1e, b1e, w2e, b2e, madd)
    return out.reshape(B, C2, H, W)


def spp_ref(x, w1, bn1, w2, bn2, pool_ks=(5, 9, 13), eps=1e-5):
    """Pure-JAX f32 reference mirroring the PyTorch SPP inference forward (NCHW)."""
    def conv1x1(t, w):
        return jnp.einsum('oc,bchw->bohw', w.reshape(w.shape[0], w.shape[1]), t)

    def bn(t, gamma, beta, mean, var):
        return (t - mean[None, :, None, None]) / jnp.sqrt(var[None, :, None, None] + eps) \
               * gamma[None, :, None, None] + beta[None, :, None, None]

    def maxpool_same(t, k):
        p = k // 2
        return jax.lax.reduce_window(
            t, -jnp.inf, jax.lax.max,
            window_dimensions=(1, 1, k, k),
            window_strides=(1, 1, 1, 1),
            padding=((0, 0), (0, 0), (p, p), (p, p)))

    y = _silu(bn(conv1x1(x, w1), *bn1))
    cat = jnp.concatenate([y] + [maxpool_same(y, k) for k in pool_ks], axis=1)
    return _silu(bn(conv1x1(cat, w2), *bn2))


if __name__ == "__main__":
    B, C1, H, W = 2, 4, 16, 16
    CM, C2 = C1 // 2, 8
    pool_ks = (5, 9, 13)

    keys = jax.random.split(jax.random.PRNGKey(0), 11)
    x = jax.random.normal(keys[0], (B, C1, H, W), jnp.float32)
    w1 = jax.random.normal(keys[1], (CM, C1, 1, 1), jnp.float32) * 0.5
    bn1 = (jax.random.uniform(keys[2], (CM,), jnp.float32, 0.5, 1.5),    # gamma
           jax.random.normal(keys[3], (CM,), jnp.float32) * 0.1,         # beta
           jax.random.normal(keys[4], (CM,), jnp.float32) * 0.1,         # running mean
           jax.random.uniform(keys[5], (CM,), jnp.float32, 0.5, 1.5))    # running var
    w2 = jax.random.normal(keys[6], (C2, (len(pool_ks) + 1) * CM, 1, 1), jnp.float32) * 0.3
    bn2 = (jax.random.uniform(keys[7], (C2,), jnp.float32, 0.5, 1.5),
           jax.random.normal(keys[8], (C2,), jnp.float32) * 0.1,
           jax.random.normal(keys[9], (C2,), jnp.float32) * 0.1,
           jax.random.uniform(keys[10], (C2,), jnp.float32, 0.5, 1.5))

    y = spp(x, w1, bn1, w2, bn2, pool_ks)
    jax.block_until_ready(y)

    y_ref = spp_ref(x, w1, bn1, w2, bn2, pool_ks)
    assert y.shape == (B, C2, H, W), y.shape
    assert y.dtype == x.dtype
    err = float(jnp.max(jnp.abs(y - y_ref)))
    # bf16 MXU operands (f32 accumulation) -> compare against the f32 reference with a
    # bf16-appropriate tolerance.
    assert jnp.allclose(y, y_ref, rtol=5e-2, atol=5e-2), f"max abs err {err}"
    print("KERNEL_OK")
</pallas_src>

<mosaic_0001>
module attributes {stable_mosaic.version = 11 : i64} {
  func.func @_spp_kernel(%arg0: i32, %arg1: memref<1x4x256xf32, #tpu.memory_space<vmem>>, %arg2: memref<2x4xbf16, #tpu.memory_space<vmem>>, %arg3: memref<2x1xf32, #tpu.memory_space<vmem>>, %arg4: memref<4x8x2xbf16, #tpu.memory_space<vmem>>, %arg5: memref<8x1xf32, #tpu.memory_space<vmem>>, %arg6: memref<8x256xf32, #tpu.memory_space<vmem>>, %arg7: memref<1x8x256xf32, #tpu.memory_space<vmem>>) attributes {dimension_semantics = [#tpu.dimension_semantics<parallel>], iteration_bounds = array<i64: 2>, scalar_prefetch = 0 : i64, scratch_operands = 0 : i64, tpu.core_type = #tpu.core_type<tc>, window_params = [{transform_indices = @transform_0, window_bounds = array<i64: 1, 4, 256>}, {pipeline_mode = #tpu.pipeline_mode<synchronous>, transform_indices = @transform_1, window_bounds = array<i64: 2, 4>}, {pipeline_mode = #tpu.pipeline_mode<synchronous>, transform_indices = @transform_2, window_bounds = array<i64: 2, 1>}, {pipeline_mode = #tpu.pipeline_mode<synchronous>, transform_indices = @transform_3, window_bounds = array<i64: 4, 8, 2>}, {pipeline_mode = #tpu.pipeline_mode<synchronous>, transform_indices = @transform_4, window_bounds = array<i64: 8, 1>}, {pipeline_mode = #tpu.pipeline_mode<synchronous>, transform_indices = @transform_5, window_bounds = array<i64: 8, 256>}, {transform_indices = @transform_6, window_bounds = array<i64: 1, 8, 256>}]} {
    %c0 = arith.constant 0 : index
    %c0_0 = arith.constant 0 : index
    %c0_1 = arith.constant 0 : index
    %0 = vector.load %arg1[%c0, %c0_0, %c0_1] : memref<1x4x256xf32, #tpu.memory_space<vmem>>, vector<1x4x256xf32>
    %1 = vector.shape_cast %0 : vector<1x4x256xf32> to vector<4x256xf32>
    %2 = arith.truncf %1 : vector<4x256xf32> to vector<4x256xbf16>
    %c0_2 = arith.constant 0 : index
    %c0_3 = arith.constant 0 : index
    %3 = vector.load %arg2[%c0_2, %c0_3] : memref<2x4xbf16, #tpu.memory_space<vmem>>, vector<2x4xbf16>
    %cst = arith.constant dense<0.000000e+00> : vector<2x256xf32>
    %4 = tpu.matmul %3, %2, %cst {dimension_numbers = #tpu.dot_dimension_numbers<[1], [0], [0], [1], [0, 0, 1, 1], [], []>} : vector<2x4xbf16>, vector<4x256xbf16>, vector<2x256xf32> -> vector<2x256xf32>
    %c0_4 = arith.constant 0 : index
    %c0_5 = arith.constant 0 : index
    %5 = vector.load %arg3[%c0_4, %c0_5] : memref<2x1xf32, #tpu.memory_space<vmem>>, vector<2x1xf32>
    %6 = vector.broadcast %5 : vector<2x1xf32> to vector<2x256xf32>
    %7 = arith.addf %4, %6 : vector<2x256xf32>
    %cst_6 = arith.constant 0.000000e+00 : f32
    %8 = vector.broadcast %cst_6 : f32 to vector<2x256xf32>
    %9 = arith.subf %8, %7 : vector<2x256xf32>
    %10 = math.exp %9 : vector<2x256xf32>
    %cst_7 = arith.constant 1.000000e+00 : f32
    %11 = vector.broadcast %cst_7 : f32 to vector<2x256xf32>
    %12 = arith.addf %11, %10 : vector<2x256xf32>
    %cst_8 = arith.constant 1.000000e+00 : f32
    %13 = vector.broadcast %cst_8 : f32 to vector<2x256xf32>
    %14 = arith.divf %13, %12 : vector<2x256xf32>
    %15 = arith.mulf %7, %14 : vector<2x256xf32>
    %c0_9 = arith.constant 0 : index
    %c0_10 = arith.constant 0 : index
    %16 = vector.load %arg6[%c0_9, %c0_10] : memref<8x256xf32, #tpu.memory_space<vmem>>, vector<8x256xf32>
    %c0_11 = arith.constant 0 : index
    %c0_12 = arith.constant 0 : index
    %c0_13 = arith.constant 0 : index
    %17 = vector.load %arg4[%c0_11, %c0_12, %c0_13] : memref<4x8x2xbf16, #tpu.memory_space<vmem>>, vector<1x8x2xbf16>
    %18 = vector.shape_cast %17 : vector<1x8x2xbf16> to vector<8x2xbf16>
    %19 = arith.truncf %15 : vector<2x256xf32> to vector<2x256xbf16>
    %cst_14 = arith.constant dense<0.000000e+00> : vector<8x256xf32>
    %20 = tpu.matmul %18, %19, %cst_14 {dimension_numbers = #tpu.dot_dimension_numbers<[1], [0], [0], [1], [0, 0, 1, 1], [], []>} : vector<8x2xbf16>, vector<2x256xbf16>, vector<8x256xf32> -> vector<8x256xf32>
    %c2_i32 = arith.constant 2 : i32
    %21 = tpu.dynamic_rotate %15 by %c2_i32 dim 1 : vector<2x256xf32>, i32 -> vector<2x256xf32>
    %22 = vector.extract_strided_slice %16 {offsets = [0, 0], sizes = [1, 256], strides = [1, 1]} : vector<8x256xf32> to vector<1x256xf32>
    %23 = vector.broadcast %22 : vector<1x256xf32> to vector<2x256xf32>
    %24 = arith.addf %21, %23 : vector<2x256xf32>
    %25 = arith.maximumf %15, %24 : vector<2x256xf32>
    %c1_i32 = arith.constant 1 : i32
    %26 = tpu.dynamic_rotate %15 by %c1_i32 dim 1 : vector<2x256xf32>, i32 -> vector<2x256xf32>
    %27 = vector.extract_strided_slice %16 {offsets = [2, 0], sizes = [1, 256], strides = [1, 1]} : vector<8x256xf32> to vector<1x256xf32>
    %28 = vector.broadcast %27 : vector<1x256xf32> to vector<2x256xf32>
    %29 = arith.addf %26, %28 : vector<2x256xf32>
    %30 = arith.maximumf %25, %29 : vector<2x256xf32>
    %c255_i32 = arith.constant 255 : i32
    %31 = tpu.dynamic_rotate %15 by %c255_i32 dim 1 : vector<2x256xf32>, i32 -> vector<2x256xf32>
    %32 = vector.extract_strided_slice %16 {offsets = [4, 0], sizes = [1, 256], strides = [1, 1]} : vector<8x256xf32> to vector<1x256xf32>
    %33 = vector.broadcast %32 : vector<1x256xf32> to vector<2x256xf32>
    %34 = arith.addf %31, %33 : vector<2x256xf32>
    %35 = arith.maximumf %30, %34 : vector<2x256xf32>
    %c254_i32 = arith.constant 254 : i32
    %36 = tpu.dynamic_rotate %15 by %c254_i32 dim 1 : vector<2x256xf32>, i32 -> vector<2x256xf32>
    %37 = vector.extract_strided_slice %16 {offsets = [6, 0], sizes = [1, 256], strides = [1, 1]} : vector<8x256xf32> to vector<1x256xf32>
    %38 = vector.broadcast %37 : vector<1x256xf32> to vector<2x256xf32>
    %39 = arith.addf %36, %38 : vector<2x256xf32>
    %40 = arith.maximumf %35, %39 : vector<2x256xf32>
    %c32_i32 = arith.constant 32 : i32
    %41 = tpu.dynamic_rotate %40 by %c32_i32 dim 1 : vector<2x256xf32>, i32 -> vector<2x256xf32>
    %42 = vector.extract_strided_slice %16 {offsets = [1, 0], sizes = [1, 256], strides = [1, 1]} : vector<8x256xf32> to vector<1x256xf32>
    %43 = vector.broadcast %42 : vector<1x256xf32> to vector<2x256xf32>
    %44 = arith.addf %41, %43 : vector<2x256xf32>
    %45 = arith.maximumf %40, %44 : vector<2x256xf32>
    %c16_i32 = arith.constant 16 : i32
    %46 = tpu.dynamic_rotate %40 by %c16_i32 dim 1 : vector<2x256xf32>, i32 -> vector<2x256xf32>
    %47 = vector.extract_strided_slice %16 {offsets = [3, 0], sizes = [1, 256], strides = [1, 1]} : vector<8x256xf32> to vector<1x256xf32>
    %48 = vector.broadcast %47 : vector<1x256xf32> to vector<2x256xf32>
    %49 = arith.addf %46, %48 : vector<2x256xf32>
    %50 = arith.maximumf %45, %49 : vector<2x256xf32>
    %c240_i32 = arith.constant 240 : i32
    %51 = tpu.dynamic_rotate %40 by %c240_i32 dim 1 : vector<2x256xf32>, i32 -> vector<2x256xf32>
    %52 = vector.extract_strided_slice %16 {offsets = [5, 0], sizes = [1, 256], strides = [1, 1]} : vector<8x256xf32> to vector<1x256xf32>
    %53 = vector.broadcast %52 : vector<1x256xf32> to vector<2x256xf32>
    %54 = arith.addf %51, %53 : vector<2x256xf32>
    %55 = arith.maximumf %50, %54 : vector<2x256xf32>
    %c224_i32 = arith.constant 224 : i32
    %56 = tpu.dynamic_rotate %40 by %c224_i32 dim 1 : vector<2x256xf32>, i32 -> vector<2x256xf32>
    %57 = vector.extract_strided_slice %16 {offsets = [7, 0], sizes = [1, 256], strides = [1, 1]} : vector<8x256xf32> to vector<1x256xf32>
    %58 = vector.broadcast %57 : vector<1x256xf32> to vector<2x256xf32>
    %59 = arith.addf %56, %58 : vector<2x256xf32>
    %60 = arith.maximumf %55, %59 : vector<2x256xf32>
    %c1 = arith.constant 1 : index
    %c0_15 = arith.constant 0 : index
    %c0_16 = arith.constant 0 : index
    %61 = vector.load %arg4[%c1, %c0_15, %c0_16] : memref<4x8x2xbf16, #tpu.memory_space<vmem>>, vector<1x8x2xbf16>
    %62 = vector.shape_cast %61 : vector<1x8x2xbf16> to vector<8x2xbf16>
    %63 = arith.truncf %60 : vector<2x256xf32> to vector<2x256xbf16>
    %cst_17 = arith.constant dense<0.000000e+00> : vector<8x256xf32>
    %64 = tpu.matmul %62, %63, %cst_17 {dimension_numbers = #tpu.dot_dimension_numbers<[1], [0], [0], [1], [0, 0, 1, 1], [], []>} : vector<8x2xbf16>, vector<2x256xbf16>, vector<8x256xf32> -> vector<8x256xf32>
    %65 = arith.addf %20, %64 : vector<8x256xf32>
    %c2_i32_18 = arith.constant 2 : i32
    %66 = tpu.dynamic_rotate %60 by %c2_i32_18 dim 1 : vector<2x256xf32>, i32 -> vector<2x256xf32>
    %67 = vector.extract_strided_slice %16 {offsets = [0, 0], sizes = [1, 256], strides = [1, 1]} : vector<8x256xf32> to vector<1x256xf32>
    %68 = vector.broadcast %67 : vector<1x256xf32> to vector<2x256xf32>
    %69 = arith.addf %66, %68 : vector<2x256xf32>
    %70 = arith.maximumf %60, %69 : vector<2x256xf32>
    %c1_i32_19 = arith.constant 1 : i32
    %71 = tpu.dynamic_rotate %60 by %c1_i32_19 dim 1 : vector<2x256xf32>, i32 -> vector<2x256xf32>
    %72 = vector.extract_strided_slice %16 {offsets = [2, 0], sizes = [1, 256], strides = [1, 1]} : vector<8x256xf32> to vector<1x256xf32>
    %73 = vector.broadcast %72 : vector<1x256xf32> to vector<2x256xf32>
    %74 = arith.addf %71, %73 : vector<2x256xf32>
    %75 = arith.maximumf %70, %74 : vector<2x256xf32>
    %c255_i32_20 = arith.constant 255 : i32
    %76 = tpu.dynamic_rotate %60 by %c255_i32_20 dim 1 : vector<2x256xf32>, i32 -> vector<2x256xf32>
    %77 = vector.extract_strided_slice %16 {offsets = [4, 0], sizes = [1, 256], strides = [1, 1]} : vector<8x256xf32> to vector<1x256xf32>
    %78 = vector.broadcast %77 : vector<1x256xf32> to vector<2x256xf32>
    %79 = arith.addf %76, %78 : vector<2x256xf32>
    %80 = arith.maximumf %75, %79 : vector<2x256xf32>
    %c254_i32_21 = arith.constant 254 : i32
    %81 = tpu.dynamic_rotate %60 by %c254_i32_21 dim 1 : vector<2x256xf32>, i32 -> vector<2x256xf32>
    %82 = vector.extract_strided_slice %16 {offsets = [6, 0], sizes = [1, 256], strides = [1, 1]} : vector<8x256xf32> to vector<1x256xf32>
    %83 = vector.broadcast %82 : vector<1x256xf32> to vector<2x256xf32>
    %84 = arith.addf %81, %83 : vector<2x256xf32>
    %85 = arith.maximumf %80, %84 : vector<2x256xf32>
    %c32_i32_22 = arith.constant 32 : i32
    %86 = tpu.dynamic_rotate %85 by %c32_i32_22 dim 1 : vector<2x256xf32>, i32 -> vector<2x256xf32>
    %87 = vector.extract_strided_slice %16 {offsets = [1, 0], sizes = [1, 256], strides = [1, 1]} : vector<8x256xf32> to vector<1x256xf32>
    %88 = vector.broadcast %87 : vector<1x256xf32> to vector<2x256xf32>
    %89 = arith.addf %86, %88 : vector<2x256xf32>
    %90 = arith.maximumf %85, %89 : vector<2x256xf32>
    %c16_i32_23 = arith.constant 16 : i32
    %91 = tpu.dynamic_rotate %85 by %c16_i32_23 dim 1 : vector<2x256xf32>, i32 -> vector<2x256xf32>
    %92 = vector.extract_strided_slice %16 {offsets = [3, 0], sizes = [1, 256], strides = [1, 1]} : vector<8x256xf32> to vector<1x256xf32>
    %93 = vector.broadcast %92 : vector<1x256xf32> to vector<2x256xf32>
    %94 = arith.addf %91, %93 : vector<2x256xf32>
    %95 = arith.maximumf %90, %94 : vector<2x256xf32>
    %c240_i32_24 = arith.constant 240 : i32
    %96 = tpu.dynamic_rotate %85 by %c240_i32_24 dim 1 : vector<2x256xf32>, i32 -> vector<2x256xf32>
    %97 = vector.extract_strided_slice %16 {offsets = [5, 0], sizes = [1, 256], strides = [1, 1]} : vector<8x256xf32> to vector<1x256xf32>
    %98 = vector.broadcast %97 : vector<1x256xf32> to vector<2x256xf32>
    %99 = arith.addf %96, %98 : vector<2x256xf32>
    %100 = arith.maximumf %95, %99 : vector<2x256xf32>
    %c224_i32_25 = arith.constant 224 : i32
    %101 = tpu.dynamic_rotate %85 by %c224_i32_25 dim 1 : vector<2x256xf32>, i32 -> vector<2x256xf32>
    %102 = vector.extract_strided_slice %16 {offsets = [7, 0], sizes = [1, 256], strides = [1, 1]} : vector<8x256xf32> to vector<1x256xf32>
    %103 = vector.broadcast %102 : vector<1x256xf32> to vector<2x256xf32>
    %104 = arith.addf %101, %103 : vector<2x256xf32>
    %105 = arith.maximumf %100, %104 : vector<2x256xf32>
    %c2 = arith.constant 2 : index
    %c0_26 = arith.constant 0 : index
    %c0_27 = arith.constant 0 : index
    %106 = vector.load %arg4[%c2, %c0_26, %c0_27] : memref<4x8x2xbf16, #tpu.memory_space<vmem>>, vector<1x8x2xbf16>
    %107 = vector.shape_cast %106 : vector<1x8x2xbf16> to vector<8x2xbf16>
    %108 = arith.truncf %105 : vector<2x256xf32> to vector<2x256xbf16>
    %cst_28 = arith.constant dense<0.000000e+00> : vector<8x256xf32>
    %109 = tpu.matmul %107, %108, %cst_28 {dimension_numbers = #tpu.dot_dimension_numbers<[1], [0], [0], [1], [0, 0, 1, 1], [], []>} : vector<8x2xbf16>, vector<2x256xbf16>, vector<8x256xf32> -> vector<8x256xf32>
    %110 = arith.addf %65, %109 : vector<8x256xf32>
    %c2_i32_29 = arith.constant 2 : i32
    %111 = tpu.dynamic_rotate %105 by %c2_i32_29 dim 1 : vector<2x256xf32>, i32 -> vector<2x256xf32>
    %112 = vector.extract_strided_slice %16 {offsets = [0, 0], sizes = [1, 256], strides = [1, 1]} : vector<8x256xf32> to vector<1x256xf32>
    %113 = vector.broadcast %112 : vector<1x256xf32> to vector<2x256xf32>
    %114 = arith.addf %111, %113 : vector<2x256xf32>
    %115 = arith.maximumf %105, %114 : vector<2x256xf32>
    %c1_i32_30 = arith.constant 1 : i32
    %116 = tpu.dynamic_rotate %105 by %c1_i32_30 dim 1 : vector<2x256xf32>, i32 -> vector<2x256xf32>
    %117 = vector.extract_strided_slice %16 {offsets = [2, 0], sizes = [1, 256], strides = [1, 1]} : vector<8x256xf32> to vector<1x256xf32>
    %118 = vector.broadcast %117 : vector<1x256xf32> to vector<2x256xf32>
    %119 = arith.addf %116, %118 : vector<2x256xf32>
    %120 = arith.maximumf %115, %119 : vector<2x256xf32>
    %c255_i32_31 = arith.constant 255 : i32
    %121 = tpu.dynamic_rotate %105 by %c255_i32_31 dim 1 : vector<2x256xf32>, i32 -> vector<2x256xf32>
    %122 = vector.extract_strided_slice %16 {offsets = [4, 0], sizes = [1, 256], strides = [1, 1]} : vector<8x256xf32> to vector<1x256xf32>
    %123 = vector.broadcast %122 : vector<1x256xf32> to vector<2x256xf32>
    %124 = arith.addf %121, %123 : vector<2x256xf32>
    %125 = arith.maximumf %120, %124 : vector<2x256xf32>
    %c254_i32_32 = arith.constant 254 : i32
    %126 = tpu.dynamic_rotate %105 by %c254_i32_32 dim 1 : vector<2x256xf32>, i32 -> vector<2x256xf32>
    %127 = vector.extract_strided_slice %16 {offsets = [6, 0], sizes = [1, 256], strides = [1, 1]} : vector<8x256xf32> to vector<1x256xf32>
    %128 = vector.broadcast %127 : vector<1x256xf32> to vector<2x256xf32>
    %129 = arith.addf %126, %128 : vector<2x256xf32>
    %130 = arith.maximumf %125, %129 : vector<2x256xf32>
    %c32_i32_33 = arith.constant 32 : i32
    %131 = tpu.dynamic_rotate %130 by %c32_i32_33 dim 1 : vector<2x256xf32>, i32 -> vector<2x256xf32>
    %132 = vector.extract_strided_slice %16 {offsets = [1, 0], sizes = [1, 256], strides = [1, 1]} : vector<8x256xf32> to vector<1x256xf32>
    %133 = vector.broadcast %132 : vector<1x256xf32> to vector<2x256xf32>
    %134 = arith.addf %131, %133 : vector<2x256xf32>
    %135 = arith.maximumf %130, %134 : vector<2x256xf32>
    %c16_i32_34 = arith.constant 16 : i32
    %136 = tpu.dynamic_rotate %130 by %c16_i32_34 dim 1 : vector<2x256xf32>, i32 -> vector<2x256xf32>
    %137 = vector.extract_strided_slice %16 {offsets = [3, 0], sizes = [1, 256], strides = [1, 1]} : vector<8x256xf32> to vector<1x256xf32>
    %138 = vector.broadcast %137 : vector<1x256xf32> to vector<2x256xf32>
    %139 = arith.addf %136, %138 : vector<2x256xf32>
    %140 = arith.maximumf %135, %139 : vector<2x256xf32>
    %c240_i32_35 = arith.constant 240 : i32
    %141 = tpu.dynamic_rotate %130 by %c240_i32_35 dim 1 : vector<2x256xf32>, i32 -> vector<2x256xf32>
    %142 = vector.extract_strided_slice %16 {offsets = [5, 0], sizes = [1, 256], strides = [1, 1]} : vector<8x256xf32> to vector<1x256xf32>
    %143 = vector.broadcast %142 : vector<1x256xf32> to vector<2x256xf32>
    %144 = arith.addf %141, %143 : vector<2x256xf32>
    %145 = arith.maximumf %140, %144 : vector<2x256xf32>
    %c224_i32_36 = arith.constant 224 : i32
    %146 = tpu.dynamic_rotate %130 by %c224_i32_36 dim 1 : vector<2x256xf32>, i32 -> vector<2x256xf32>
    %147 = vector.extract_strided_slice %16 {offsets = [7, 0], sizes = [1, 256], strides = [1, 1]} : vector<8x256xf32> to vector<1x256xf32>
    %148 = vector.broadcast %147 : vector<1x256xf32> to vector<2x256xf32>
    %149 = arith.addf %146, %148 : vector<2x256xf32>
    %150 = arith.maximumf %145, %149 : vector<2x256xf32>
    %c3 = arith.constant 3 : index
    %c0_37 = arith.constant 0 : index
    %c0_38 = arith.constant 0 : index
    %151 = vector.load %arg4[%c3, %c0_37, %c0_38] : memref<4x8x2xbf16, #tpu.memory_space<vmem>>, vector<1x8x2xbf16>
    %152 = vector.shape_cast %151 : vector<1x8x2xbf16> to vector<8x2xbf16>
    %153 = arith.truncf %150 : vector<2x256xf32> to vector<2x256xbf16>
    %cst_39 = arith.constant dense<0.000000e+00> : vector<8x256xf32>
    %154 = tpu.matmul %152, %153, %cst_39 {dimension_numbers = #tpu.dot_dimension_numbers<[1], [0], [0], [1], [0, 0, 1, 1], [], []>} : vector<8x2xbf16>, vector<2x256xbf16>, vector<8x256xf32> -> vector<8x256xf32>
    %155 = arith.addf %110, %154 : vector<8x256xf32>
    %c0_40 = arith.constant 0 : index
    %c0_41 = arith.constant 0 : index
    %156 = vector.load %arg5[%c0_40, %c0_41] : memref<8x1xf32, #tpu.memory_space<vmem>>, vector<8x1xf32>
    %157 = vector.broadcast %156 : vector<8x1xf32> to vector<8x256xf32>
    %158 = arith.addf %155, %157 : vector<8x256xf32>
    %cst_42 = arith.constant 0.000000e+00 : f32
    %159 = vector.broadcast %cst_42 : f32 to vector<8x256xf32>
    %160 = arith.subf %159, %158 : vector<8x256xf32>
    %161 = math.exp %160 : vector<8x256xf32>
    %cst_43 = arith.constant 1.000000e+00 : f32
    %162 = vector.broadcast %cst_43 : f32 to vector<8x256xf32>
    %163 = arith.addf %162, %161 : vector<8x256xf32>
    %cst_44 = arith.constant 1.000000e+00 : f32
    %164 = vector.broadcast %cst_44 : f32 to vector<8x256xf32>
    %165 = arith.divf %164, %163 : vector<8x256xf32>
    %166 = arith.mulf %158, %165 : vector<8x256xf32>
    %c0_45 = arith.constant 0 : index
    %c0_46 = arith.constant 0 : index
    %c0_47 = arith.constant 0 : index
    %167 = vector.load %arg7[%c0_45, %c0_46, %c0_47] : memref<1x8x256xf32, #tpu.memory_space<vmem>>, vector<1x8x256xf32>
    %168 = vector.shape_cast %167 : vector<1x8x256xf32> to vector<8x256xf32>
    %169 = vector.shape_cast %166 : vector<8x256xf32> to vector<1x8x256xf32>
    tpu.vector_store %arg7[%c0_45, %c0_46, %c0_47], %169 {strides = array<i32>} : memref<1x8x256xf32, #tpu.memory_space<vmem>>, vector<1x8x256xf32>,
    return
  }
  func.func @transform_0(%arg0: i32) -> (i32, i32, i32) {
    %c0_i32 = arith.constant 0 : i32
    %c0_i32_0 = arith.constant 0 : i32
    %c0_i32_1 = arith.constant 0 : i32
    return %arg0, %c0_i32, %c0_i32_0 : i32, i32, i32
  }
  func.func @transform_1(%arg0: i32) -> (i32, i32) {
    %c0_i32 = arith.constant 0 : i32
    %c0_i32_0 = arith.constant 0 : i32
    %c0_i32_1 = arith.constant 0 : i32
    return %c0_i32, %c0_i32_0 : i32, i32
  }
  func.func @transform_2(%arg0: i32) -> (i32, i32) {
    %c0_i32 = arith.constant 0 : i32
    %c0_i32_0 = arith.constant 0 : i32
    %c0_i32_1 = arith.constant 0 : i32
    return %c0_i32, %c0_i32_0 : i32, i32
  }
  func.func @transform_3(%arg0: i32) -> (i32, i32, i32) {
    %c0_i32 = arith.constant 0 : i32
    %c0_i32_0 = arith.constant 0 : i32
    %c0_i32_1 = arith.constant 0 : i32
    %c0_i32_2 = arith.constant 0 : i32
    return %c0_i32, %c0_i32_0, %c0_i32_1 : i32, i32, i32
  }
  func.func @transform_4(%arg0: i32) -> (i32, i32) {
    %c0_i32 = arith.constant 0 : i32
    %c0_i32_0 = arith.constant 0 : i32
    %c0_i32_1 = arith.constant 0 : i32
    return %c0_i32, %c0_i32_0 : i32, i32
  }
  func.func @transform_5(%arg0: i32) -> (i32, i32) {
    %c0_i32 = arith.constant 0 : i32
    %c0_i32_0 = arith.constant 0 : i32
    %c0_i32_1 = arith.constant 0 : i32
    return %c0_i32, %c0_i32_0 : i32, i32
  }
  func.func @transform_6(%arg0: i32) -> (i32, i32, i32) {
    %c0_i32 = arith.constant 0 : i32
    %c0_i32_0 = arith.constant 0 : i32
    %c0_i32_1 = arith.constant 0 : i32
    return %arg0, %c0_i32, %c0_i32_0 : i32, i32, i32
  }
}

</mosaic_0001>

<bundles_post_ra>
// kernel: tpu_custom_call.1
= control target key start
LH: loop header
LB: loop body
LE: loop exit
PB: predicated region body
PF: predicated region fallthrough
CT: control target
= control target key end

     0   :  { %11 = vsyncpa [#allocation3], 0  ;;  %s1681_s0 = inlined_call_operand.vmem [shape: f32[2,4,256], index: 0, kind: input, shape index: {}]   ;;  %s1682_s1 = inlined_call_operand.hbm [shape: bf16[2,4], index: 1, kind: input, shape index: {}]   ;;  %s1683_s2 = inlined_call_operand.vmem [shape: f32[2,1], index: 2, kind: input, shape index: {}]   ;;  %s1684_s3 = inlined_call_operand.vmem [shape: bf16[4,8,2], index: 3, kind: input, shape index: {}]   ;;  %s1685_s4 = inlined_call_operand.vmem [shape: f32[8,1], index: 4, kind: input, shape index: {}]   ;;  %s1686_s5 = inlined_call_operand.vmem [shape: f32[8,256], index: 5, kind: input, shape index: {}]   ;;  %s1687_s6 = inlined_call_operand.hbm [shape: f32[2,8,256], index: 6, kind: output, shape index: {}]  }
   0x1   :  { %12 = vsyncpa [#allocation4], 0 }
   0x2   :  { %14 = vsyncpa [#allocation4 + $0x1], 0  ;;  %s1239_s21 = smov 0   ;;  %s1241_s22 = smov 0  }
   0x3   :  { %s1243_s23 = smov 0   ;;  %s1245_s24 = smov 0  }
   0x4 LB: > { %s1260_s25 = sadd.s32 4294967295, %s1191_s24   ;;  %s990_s26 = sadd.s32 4294967294, %s1191_s24   ;;  %s1191_s24 = sphi %s1245_s24, %s1703_s24   ;;  %s1187_s23 = sphi %s1243_s23, %s1702_s23   ;;  %s1183_s22 = sphi %s1241_s22, %s1701_s22   ;;  %s1179_s21 = sphi %s1239_s21, %s1700_s21  }
   0x5   : > { %s1264_s27 = sadd.s32 1, %s1191_s24   ;;  %s158_s28 = sadd.s32 1, %s1187_s23 }
   0x6   : > { %s155_s29 = ssub.s32 %s1191_s24, %s1264_s27  ;;  %p168_p0 = scmp.ne.s32.totalorder %s1187_s23, %s1183_s22 }
   0x7   : > { %p156_p1 = scmp.eq.s32.totalorder %s155_s29, 0  ;;  %p169_p2 = scmp.eq.s32.totalorder %s1260_s25, 1 }
   0x8   : > { %p174_p3 = scmp.ne.s32.totalorder %s1183_s22, %s1179_s21  ;;  %p175_p4 = scmp.eq.s32.totalorder %s990_s26, 1 }
   0x9   : > { %s1275_s30 = scalar_select %p156_p1, %s1187_s23, %s158_s28  }
   0xa   : > { %p1277_p5 = por %p169_p2, %p168_p0  ;;  %p1281_p6 = por %p175_p4, %p174_p3 }
   0xb   : > { %p991_p7 = scmp.ge.s32.totalorder %s1191_s24, 1  ;;  %p182_p8 = scmp.lt.s32.totalorder %s1191_s24, 3 }
   0xc   : > { %s1691_s7 = scalar_select %p1277_p5, 1, 0 }
   0xd   : > { %s1692_s8 = scalar_select %p1281_p6, 1, 0 }
   0xe   : > { %p1688_p9 = scmp.eq.s32.totalorder %s1260_s25, 0  ;;  %p1288_p10 = pnand %p991_p7, %p182_p8 }
   0xf   : > { %s1193_s10 = smov [#allocation2]   ;;  %s1097_s15 = scalar_lea.hbm %s1682_s1, 16 }
  0x10   : > { %s1693_s9 = scalar_select %p1288_p10, 1, 0 }
  0x11   : > { %s195_s11 = sshll.u32 %s1193_s10, 4  ;;  %p1025_p11 = pneg %p1288_p10  ;;  %s196_s11 = int_to_ptr.vmem [resolvable:$true] %s195_s11 }
  0x12   : > { %p1098_p13 = scmp.ne.s32.totalorder %s1682_s1, %s1097_s15  ;;  %p1104_p3 = scmp.lt.u32.totalorder %s1097_s15, %s1682_s1 }
  0x13   : > { %p1296_p12 = pnand %p1688_p9, %p1025_p11 }
  0x15   : > { %p1099_p0 = pneg %p1296_p12 }
  0x17   : > { %p1100_p1 = pnand %p1099_p0, %p1098_p13 }
  0x19   : > { %p1101_p2 = pneg %p1100_p1 }
  0x1b   : > { %p1106_p4 = pnand %p1104_p3, %p1101_p2 }
  0x1d   : > { %1109 = shalt.err (!%p1106_p4)
}
  0x1e   : > { %s1110_s20 = scalar_lea.vmem %s196_s11, 16  ;;  %s1117_s26 = scalar_lea.vmem %s196_s11, 32 }
  0x1f   : > { %p1111_p7 = scmp.ne.s32.totalorder %s196_s11, %s1110_s20  ;;  %p1118_p9 = scmp.lt.s32.totalorder %s196_s11, %s196_s11 }
  0x20   : > { %p1119_p6 = scmp.lt.s32.totalorder %s1117_s26, %s1110_s20 }
  0x21   : > { %p1113_p8 = pnand %p1111_p7, %p1099_p0 }
  0x22   : > { %p1120_p5 = por %p1119_p6, %p1118_p9 }
  0x23   : > { %p1114_p11 = pneg %p1113_p8 }
  0x25   : > { %p1121_p10 = pnand %p1120_p5, %p1114_p11 }
  0x27   : > { %1124 = shalt.err (!%p1121_p10)
}
  0x28   : > { %1028 = dma.hbm_to_vmem [thread:$0]  (!%p1296_p12), %s1682_s1, 16, %s196_s11, [#allocation3]  }
  0x29   : > { %p1695_p13 = scmp.ne.s32.totalorder %s1693_s9, 0 }
  0x2a   : > { %p1696_p1 = scmp.eq.s32.totalorder (!%p1695_p13), %s1260_s25, 0 }
  0x2b   : > { %228 = sbr.rel (%p1695_p13) target bundleno = 1369 (0x559), region = 44 }
  0x32   : > { %1170 = dma.done.wait (%p1696_p1), [#allocation3], 16   ;;  %p1697_p0 = pmov %p1696_p1 }
  0x33   : > { %p258_p6 = scmp.lt.s32.totalorder %s1260_s25, 1  ;;  %v1194_v0 = vmov 0   ;;  %vm281_vm0 = vcmask 1041408   ;;  %v271_v2 = vld [vmem:[%s1683_s2] sm:$0x3]  ;;  %vm277_vm1 = vcmask 31744   ;;  %v352_v30 = vlaneseq }
  0x34   : > { %1172 = vsyncadd (%p1697_p0), [#allocation3], 4294967280  ;;  %320 = vmatprep.mubr.bf16.mxu0 %v1194_v0  ;;  %1078 = vset.pattern.permute.xlu0 %v1194_v0  ;;  %v270_v7 = vld [vmem:[#allocation2] sm:$0x1]  ;;  %vm510_vm2 = vcmask 1040384   ;;  %s1195_s16 = smov 1  }
  0x35   : > { %s259_s10 = scalar_select %p258_p6, %s1260_s25, 1  ;;  %549 = vmatprep.mubr.bf16.mxu1 %v1194_v0  ;;  %1079 = vset.pattern.permute.xlu1 %v1194_v0  ;;  %v1345_v31 = vshrl.u32 %v352_v30, 7  ;;  %v1347_v32 = vand.u32 127, %v352_v30  ;;  %v1353_v34 = vld [vmem:[%s1686_s5] sm:$0xff]  ;;  %v1358_v35 = vld [vmem:[%s1686_s5 + $0x8] sm:$0xff]  ;;  %vm506_vm11 = vcmask 15360  }
  0x36   : > { %274 = vperm.xlu0 %1078, %v271_v2   ;;  %s1196_s17 = smov 2   ;;  %s1197_s18 = smov 127  }
  0x37   : > { %s1017_s9 = sshll.u32 %s259_s10, 3  ;;  %s1198_s19 = smov 126   ;;  %v359_v33 = vsub.s32 0, %v1345_v31  ;;  %v378_v38 = vsub.s32 2, %v1345_v31  ;;  %vm354_vm3 = vcmp.lt.s32.totalorder %v1347_v32, 2  ;;  %vm373_vm4 = vcmp.lt.s32.totalorder %v1347_v32, 1 }
  0x38   : > { %s262_s13 = scalar_lea.vmem %s1681_s0, %s1017_s9  ;;  %v397_v41 = vsub.s32 4, %v1345_v31  ;;  %vm392_vm5 = vcmp.lt.s32.totalorder %v1347_v32, 127  ;;  %v416_v46 = vsub.s32 6, %v1345_v31  ;;  %vm411_vm6 = vcmp.lt.s32.totalorder %v1347_v32, 126  ;;  %s1199_s10 = smov 32  }
  0x39   : > { %v264_v1 = vld [vmem:[%s262_s13] sm:$0xff]  ;;  %v1363_v39 = vrot.slane %v1353_v34, %v359_v33  ;;  %v1366_v40 = vrot.slane %v1358_v35, %v359_v33  ;;  %v1371_v43 = vrot.slane %v1353_v34, %v378_v38  ;;  %v1374_v44 = vrot.slane %v1358_v35, %v378_v38  ;;  %s1200_s9 = smov 16   ;;  %s1201_s11 = smov 112  }
  0x3a   : > { %v266_v3 = vcombine.high %v264_v1, %v264_v1  ;;  %v268_v4 = vpack.c.bf16 %v264_v1, %v264_v1  ;;  %v1389_v53 = vrot.slane %v1353_v34, %v397_v41  ;;  %v1392_v54 = vrot.slane %v1358_v35, %v397_v41  ;;  %s1202_s12 = smov 96   ;;  %s255_s29 = sand.u32 1, %s1183_s22  }
  0x3b   : > { %v1402_v63 = vrot.slane %v1353_v34, %v416_v46  ;;  %v1405_v1 = vrot.slane %v1358_v35, %v416_v46  ;;  %vm430_vm7 = vcmp.lt.s32.totalorder %v1347_v32, 32  ;;  %vm449_vm8 = vcmp.lt.s32.totalorder %v1347_v32, 16  ;;  %p1698_p9 = scmp.ne.s32.totalorder %s1691_s7, 0 }
  0x3c   : > { %v269_v5 = vpack.c.bf16 %v266_v3, %v266_v3  ;;  %v283_v6 = vsel %vm281_vm0, %v268_v4, 0  ;;  %vm468_vm9 = vcmp.lt.s32.totalorder %v1347_v32, 112  ;;  %v492_v33 = vsub.s32 7, %v1345_v31 }
  0x3d   : > { %vm487_vm10 = vcmp.lt.s32.totalorder %v1347_v32, 96  ;;  %v1009_v32 = vld [vmem:[%s1684_s3 + $0xc] sm:$0xf] }
  0x3e   : > { %999 = vmatprep.subr.msk.bf16.mxu0 %vm281_vm0, %v269_v5 }
  0x3f   : > { %289 = vmatpush1.bf16.msra.mxu0 %v283_v6 }
  0x42   : > { %1000 = vmatmul.mubr.msk.bf16.vlgmr.msra.gmra.mrb[0].mxu0 %vm277_vm1, %v270_v7 }
  0x43   : > { %599 = vmatprep.mubr.bf16.mxu0 %v1194_v0 }
  0xb5   : > { %v275_v8 = vpop.permute.xlu0 %274 }
 0x115   : > { %v322_v9 = vpop.f32.mrb[0].mxu0 }
 0x116   : > { %v323_v10 = vadd.f32 %v322_v9, %v275_v8  ;;  %v324_v11 = vpop.f32.mrb[1].mxu0 }
 0x117   : > { %v325_v12 = vadd.f32 %v324_v11, %v275_v8  ;;  %v326_v13 = vpop.f32.mrb[2].mxu0 }
 0x118   : > { %v329_v14 = vsub.f32 0.0, %v323_v10  ;;  %v327_v15 = vpop.f32.mrb[3].mxu0 }
 0x119   : > { %v330_v16 = vsub.f32 0.0, %v325_v12 }
 0x11a   : > { %v331_v17 = vmul.f32 1.442695, %v329_v14 }
 0x11b   : > { %v333_v18 = vmul.f32 1.442695, %v330_v16  ;;  %v435_v16 = vsub.s32 1, %v1345_v31 }
 0x11c   : > { %1081 = vpow2.f32 %v331_v17 }
 0x11d   : > { %1083 = vpow2.f32 %v333_v18 }
 0x126   : > { %v1082_v19 = vpop.eup %1081 }
 0x127   : > { %v1084_v20 = vpop.eup %1083  ;;  %v335_v21 = vadd.f32 1.0, %v1082_v19  ;;  %v454_v19 = vsub.s32 3, %v1345_v31 }
 0x128   : > { %v336_v22 = vadd.f32 1.0, %v1084_v20  ;;  %v1427_v20 = vrot.slane %v1353_v34, %v435_v16 }
 0x129   : > { %1085 = vrcp.f32 %v335_v21  ;;  %v1430_v21 = vrot.slane %v1358_v35, %v435_v16 }
 0x12a   : > { %1087 = vrcp.f32 %v336_v22  ;;  %v473_v22 = vsub.s32 5, %v1345_v31 }
 0x12c   : > { %v1453_v38 = vrot.slane %v1353_v34, %v473_v22  ;;  %v1456_v41 = vrot.slane %v1358_v35, %v473_v22 }
 0x133   : > { %v1086_v23 = vpop.eup %1085 }
 0x134   : > { %v1088_v24 = vpop.eup %1087  ;;  %v341_v25 = vmul.f32 %v1086_v23, %v323_v10 }
 0x135   : > { %v342_v26 = vmul.f32 %v1088_v24, %v325_v12 }
 0x136   : > { %369 = vrot.lane.b32.xlu1 %v341_v25, %s1195_s16  ;;  %348 = vrot.lane.b32.xlu0 %v341_v25, %s1196_s17  ;;  %v346_v27 = vpack.c.bf16 %v341_v25, %v341_v25 }
 0x137   : > { %v347_v28 = vpack.c.bf16 %v342_v26, %v342_v26 }
 0x138   : > { %v562_v29 = vsel %vm510_vm2, %v346_v27, 0  ;;  %v1442_v27 = vrot.slane %v1358_v35, %v454_v19 }
 0x139   : > { %1004 = vmatprep.subr.msk.bf16.mxu0 %vm510_vm2, %v347_v28 }
 0x13a   : > { %350 = vrot.lane.b32.xlu1 %v342_v26, %s1196_s17  ;;  %371 = vrot.lane.b32.xlu0 %v342_v26, %s1195_s16 }
 0x13b   : > { %568 = vmatpush1.bf16.msra.mxu0 %v562_v29 }
 0x13e   : > { %388 = vrot.lane.b32.xlu1 %v341_v25, %s1197_s18  ;;  %390 = vrot.lane.b32.xlu0 %v342_v26, %s1197_s18 }
 0x142   : > { %407 = vrot.lane.b32.xlu1 %v341_v25, %s1198_s19  ;;  %409 = vrot.lane.b32.xlu0 %v342_v26, %s1198_s19 }
 0x1a8   : > { %v370_v36 = vpop.permute.xlu1 %369  ;;  %v349_v37 = vpop.permute.xlu0 %348 }
 0x1ac   : > { %v351_v42 = vpop.permute.xlu1 %350  ;;  %v372_v45 = vpop.permute.xlu0 %371 }
 0x1ad   : > { %v355_v47 = vsel %vm354_vm3, %v349_v37, %v351_v42  ;;  %v356_v48 = vsel %vm354_vm3, %v351_v42, %v349_v37  ;;  %v374_v49 = vsel %vm373_vm4, %v370_v36, %v372_v45  ;;  %v375_v50 = vsel %vm373_vm4, %v372_v45, %v370_v36 }
 0x1ae   : > { %v365_v51 = vadd.f32 %v1363_v39, %v356_v48  ;;  %v366_v52 = vadd.f32 %v1366_v40, %v355_v47  ;;  %v384_v57 = vadd.f32 %v1371_v43, %v375_v50  ;;  %v385_v58 = vadd.f32 %v1374_v44, %v374_v49 }
 0x1af   : > { %v1466_v49 = vrot.slane %v1353_v34, %v492_v33  ;;  %v1469_v50 = vrot.slane %v1358_v35, %v492_v33 }
 0x1b0   : > { %v367_v55 = vmax.f32 %v341_v25, %v365_v51  ;;  %v368_v56 = vmax.f32 %v342_v26, %v366_v52  ;;  %v389_v59 = vpop.permute.xlu1 %388  ;;  %v391_v60 = vpop.permute.xlu0 %390  ;;  %v1439_v26 = vrot.slane %v1353_v34, %v454_v19 }
 0x1b1   : > { %v393_v61 = vsel %vm392_vm5, %v389_v59, %v391_v60  ;;  %v394_v62 = vsel %vm392_vm5, %v391_v60, %v389_v59 }
 0x1b2   : > { %v386_v2 = vmax.f32 %v367_v55, %v384_v57  ;;  %v387_v3 = vmax.f32 %v368_v56, %v385_v58  ;;  %v403_v4 = vadd.f32 %v1389_v53, %v393_v61  ;;  %v404_v5 = vadd.f32 %v1392_v54, %v394_v62 }
 0x1b4   : > { %v408_v6 = vpop.permute.xlu1 %407  ;;  %v410_v7 = vpop.permute.xlu0 %409  ;;  %v405_v10 = vmax.f32 %v386_v2, %v403_v4  ;;  %v406_v11 = vmax.f32 %v387_v3, %v404_v5 }
 0x1b5   : > { %v412_v8 = vsel %vm411_vm6, %v408_v6, %v410_v7  ;;  %v413_v9 = vsel %vm411_vm6, %v410_v7, %v408_v6 }
 0x1b6   : > { %v422_v12 = vadd.f32 %v1402_v63, %v412_v8  ;;  %v423_v13 = vadd.f32 %v1405_v1, %v413_v9 }
 0x1b8   : > { %v424_v14 = vmax.f32 %v405_v10, %v422_v12  ;;  %v425_v15 = vmax.f32 %v406_v11, %v423_v13 }
 0x1ba   : > { %428 = vrot.lane.b32.xlu0 %v425_v15, %s1199_s10  ;;  %426 = vrot.lane.b32.xlu1 %v424_v14, %s1199_s10 }
 0x1be   : > { %447 = vrot.lane.b32.xlu0 %v425_v15, %s1200_s9  ;;  %445 = vrot.lane.b32.xlu1 %v424_v14, %s1200_s9 }
 0x1c2   : > { %466 = vrot.lane.b32.xlu0 %v425_v15, %s1201_s11  ;;  %464 = vrot.lane.b32.xlu1 %v424_v14, %s1201_s11 }
 0x1c6   : > { %485 = vrot.lane.b32.xlu0 %v425_v15, %s1202_s12  ;;  %483 = vrot.lane.b32.xlu1 %v424_v14, %s1202_s12 }
 0x22c   : > { %v429_v17 = vpop.permute.xlu0 %428  ;;  %v427_v18 = vpop.permute.xlu1 %426 }
 0x22d   : > { %v431_v23 = vsel %vm430_vm7, %v427_v18, %v429_v17  ;;  %v432_v24 = vsel %vm430_vm7, %v429_v17, %v427_v18 }
 0x22e   : > { %v441_v36 = vadd.f32 %v1427_v20, %v432_v24  ;;  %v442_v37 = vadd.f32 %v1430_v21, %v431_v23 }
 0x230   : > { %v448_v25 = vpop.permute.xlu0 %447  ;;  %v446_v28 = vpop.permute.xlu1 %445  ;;  %v443_v51 = vmax.f32 %v424_v14, %v441_v36  ;;  %v444_v52 = vmax.f32 %v425_v15, %v442_v37 }
 0x231   : > { %v450_v29 = vsel %vm449_vm8, %v446_v28, %v448_v25  ;;  %v451_v30 = vsel %vm449_vm8, %v448_v25, %v446_v28 }
 0x232   : > { %v460_v42 = vadd.f32 %v1439_v26, %v451_v30  ;;  %v461_v45 = vadd.f32 %v1442_v27, %v450_v29 }
 0x234   : > { %v467_v46 = vpop.permute.xlu0 %466  ;;  %v465_v47 = vpop.permute.xlu1 %464  ;;  %v462_v57 = vmax.f32 %v443_v51, %v460_v42  ;;  %v463_v58 = vmax.f32 %v444_v52, %v461_v45 }
 0x235   : > { %v469_v31 = vsel %vm468_vm9, %v465_v47, %v467_v46  ;;  %v470_v48 = vsel %vm468_vm9, %v467_v46, %v465_v47 }
 0x236   : > { %v479_v55 = vadd.f32 %v1453_v38, %v469_v31  ;;  %v480_v56 = vadd.f32 %v1456_v41, %v470_v48 }
 0x238   : > { %v486_v59 = vpop.permute.xlu0 %485  ;;  %v484_v60 = vpop.permute.xlu1 %483  ;;  %v481_v62 = vmax.f32 %v462_v57, %v479_v55  ;;  %v482_v2 = vmax.f32 %v463_v58, %v480_v56  ;;  %v1001_v58 = vld [vmem:[%s1684_s3 + $0x4] sm:$0xf] }
 0x239   : > { %v488_v61 = vsel %vm487_vm10, %v484_v60, %v486_v59  ;;  %v489_v34 = vsel %vm487_vm10, %v486_v59, %v484_v60 }
 0x23a   : > { %v498_v35 = vadd.f32 %v1466_v49, %v488_v61  ;;  %v499_v3 = vadd.f32 %v1469_v50, %v489_v34 }
 0x23c   : > { %v500_v4 = vmax.f32 %v481_v62, %v498_v35  ;;  %v501_v5 = vmax.f32 %v482_v2, %v499_v3 }
 0x23e   : > { %610 = vrot.lane.b32.xlu0 %v501_v5, %s1196_s17  ;;  %608 = vrot.lane.b32.xlu1 %v500_v4, %s1196_s17  ;;  %v505_v6 = vpack.c.bf16 %v501_v5, %v501_v5  ;;  %v504_v7 = vpack.c.bf16 %v500_v4, %v500_v4 }
 0x240   : > { %1002 = vmatprep.subr.msk.bf16.mxu1 %vm510_vm2, %v505_v6  ;;  %v512_v8 = vsel %vm510_vm2, %v504_v7, 0 }
 0x241   : > { %518 = vmatpush1.bf16.msra.mxu1 %v512_v8 }
 0x242   : > { %620 = vrot.lane.b32.xlu0 %v501_v5, %s1195_s16  ;;  %618 = vrot.lane.b32.xlu1 %v500_v4, %s1195_s16 }
 0x244   : > { %1003 = vmatmul.mubr.msk.bf16.vlgmr.msra.gmra.mrb[0].mxu1 %vm506_vm11, %v1001_v58 }
 0x245   : > { %733 = vmatprep.mubr.bf16.mxu1 %v1194_v0 }
 0x246   : > { %630 = vrot.lane.b32.xlu0 %v501_v5, %s1197_s18  ;;  %628 = vrot.lane.b32.xlu1 %v500_v4, %s1197_s18 }
 0x24a   : > { %640 = vrot.lane.b32.xlu0 %v501_v5, %s1198_s19  ;;  %638 = vrot.lane.b32.xlu1 %v500_v4, %s1198_s19 }
 0x2b0   : > { %v611_v9 = vpop.permute.xlu0 %610  ;;  %v609_v10 = vpop.permute.xlu1 %608 }
 0x2b1   : > { %v612_v11 = vsel %vm354_vm3, %v609_v10, %v611_v9  ;;  %v613_v12 = vsel %vm354_vm3, %v611_v9, %v609_v10 }
 0x2b2   : > { %v614_v17 = vadd.f32 %v613_v12, %v1363_v39  ;;  %v615_v18 = vadd.f32 %v612_v11, %v1366_v40 }
 0x2b4   : > { %v621_v13 = vpop.permute.xlu0 %620  ;;  %v619_v14 = vpop.permute.xlu1 %618  ;;  %v616_v29 = vmax.f32 %v500_v4, %v614_v17  ;;  %v617_v30 = vmax.f32 %v501_v5, %v615_v18 }
 0x2b5   : > { %v622_v15 = vsel %vm373_vm4, %v619_v14, %v621_v13  ;;  %v623_v16 = vsel %vm373_vm4, %v621_v13, %v619_v14 }
 0x2b6   : > { %v624_v19 = vadd.f32 %v623_v16, %v1371_v43  ;;  %v625_v22 = vadd.f32 %v622_v15, %v1374_v44 }
 0x2b8   : > { %v631_v23 = vpop.permute.xlu0 %630  ;;  %v629_v24 = vpop.permute.xlu1 %628  ;;  %v626_v37 = vmax.f32 %v616_v29, %v624_v19  ;;  %v627_v42 = vmax.f32 %v617_v30, %v625_v22 }
 0x2b9   : > { %v632_v25 = vsel %vm392_vm5, %v629_v24, %v631_v23  ;;  %v633_v28 = vsel %vm392_vm5, %v631_v23, %v629_v24 }
 0x2ba   : > { %v634_v33 = vadd.f32 %v632_v25, %v1389_v53  ;;  %v635_v36 = vadd.f32 %v633_v28, %v1392_v54 }
 0x2bc   : > { %v641_v45 = vpop.permute.xlu0 %640  ;;  %v639_v46 = vpop.permute.xlu1 %638  ;;  %v636_v48 = vmax.f32 %v626_v37, %v634_v33  ;;  %v637_v51 = vmax.f32 %v627_v42, %v635_v36 }
 0x2bd   : > { %v642_v47 = vsel %vm411_vm6, %v639_v46, %v641_v45  ;;  %v643_v31 = vsel %vm411_vm6, %v641_v45, %v639_v46 }
 0x2be   : > { %v644_v52 = vadd.f32 %v642_v47, %v1402_v63  ;;  %v645_v55 = vadd.f32 %v643_v31, %v1405_v1 }
 0x2c0   : > { %v646_v56 = vmax.f32 %v636_v48, %v644_v52  ;;  %v647_v57 = vmax.f32 %v637_v51, %v645_v55 }
 0x2c2   : > { %650 = vrot.lane.b32.xlu0 %v647_v57, %s1199_s10  ;;  %648 = vrot.lane.b32.xlu1 %v646_v56, %s1199_s10 }
 0x2c6   : > { %660 = vrot.lane.b32.xlu0 %v647_v57, %s1200_s9  ;;  %658 = vrot.lane.b32.xlu1 %v646_v56, %s1200_s9 }
 0x2ca   : > { %670 = vrot.lane.b32.xlu0 %v647_v57, %s1201_s11  ;;  %668 = vrot.lane.b32.xlu1 %v646_v56, %s1201_s11 }
 0x2ce   : > { %680 = vrot.lane.b32.xlu0 %v647_v57, %s1202_s12  ;;  %678 = vrot.lane.b32.xlu1 %v646_v56, %s1202_s12 }
 0x334   : > { %v651_v59 = vpop.permute.xlu0 %650  ;;  %v649_v60 = vpop.permute.xlu1 %648 }
 0x335   : > { %v652_v61 = vsel %vm430_vm7, %v649_v60, %v651_v59  ;;  %v653_v34 = vsel %vm430_vm7, %v651_v59, %v649_v60 }
 0x336   : > { %v654_v4 = vadd.f32 %v653_v34, %v1427_v20  ;;  %v655_v5 = vadd.f32 %v652_v61, %v1430_v21 }
 0x338   : > { %v661_v62 = vpop.permute.xlu0 %660  ;;  %v659_v2 = vpop.permute.xlu1 %658  ;;  %v656_v12 = vmax.f32 %v646_v56, %v654_v4  ;;  %v657_v13 = vmax.f32 %v647_v57, %v655_v5 }
 0x339   : > { %v662_v35 = vsel %vm449_vm8, %v659_v2, %v661_v62  ;;  %v663_v3 = vsel %vm449_vm8, %v661_v62, %v659_v2 }
 0x33a   : > { %v664_v6 = vadd.f32 %v663_v3, %v1439_v26  ;;  %v665_v7 = vadd.f32 %v662_v35, %v1442_v27 }
 0x33c   : > { %v671_v8 = vpop.permute.xlu0 %670  ;;  %v669_v9 = vpop.permute.xlu1 %668  ;;  %v666_v16 = vmax.f32 %v656_v12, %v664_v6  ;;  %v667_v17 = vmax.f32 %v657_v13, %v665_v7  ;;  %v1006_v12 = vld [vmem:[%s1684_s3 + $0x8] sm:$0xf] }
 0x33d   : > { %v672_v10 = vsel %vm468_vm9, %v669_v9, %v671_v8  ;;  %v673_v11 = vsel %vm468_vm9, %v671_v8, %v669_v9 }
 0x33e   : > { %v674_v14 = vadd.f32 %v672_v10, %v1453_v38  ;;  %v675_v15 = vadd.f32 %v673_v11, %v1456_v41 }
 0x340   : > { %v681_v18 = vpop.permute.xlu0 %680  ;;  %v679_v19 = vpop.permute.xlu1 %678  ;;  %v676_v24 = vmax.f32 %v666_v16, %v674_v14  ;;  %v677_v25 = vmax.f32 %v667_v17, %v675_v15  ;;  %v880_v14 = vld [vmem:[%s1685_s4] sm:$0xff] }
 0x341   : > { %v682_v22 = vsel %vm487_vm10, %v679_v19, %v681_v18  ;;  %v683_v23 = vsel %vm487_vm10, %v681_v18, %v679_v19 }
 0x342   : > { %v684_v28 = vadd.f32 %v682_v22, %v1466_v49  ;;  %v685_v29 = vadd.f32 %v683_v23, %v1469_v50 }
 0x344   : > { %v686_v30 = vmax.f32 %v676_v24, %v684_v28  ;;  %v687_v33 = vmax.f32 %v677_v25, %v685_v29 }
 0x346   : > { %746 = vrot.lane.b32.xlu0 %v687_v33, %s1196_s17  ;;  %744 = vrot.lane.b32.xlu1 %v686_v30, %s1196_s17  ;;  %v691_v36 = vpack.c.bf16 %v687_v33, %v687_v33  ;;  %v690_v37 = vpack.c.bf16 %v686_v30, %v686_v30  ;;  %s1203_s17 = smov [#allocation5]  }
 0x348   : > { %1007 = vmatprep.subr.msk.bf16.mxu1 %vm510_vm2, %v691_v36  ;;  %v696_v42 = vsel %vm510_vm2, %v690_v37, 0 }
 0x349   : > { %702 = vmatpush1.bf16.msra.mxu1 %v696_v42 }
 0x34a   : > { %756 = vrot.lane.b32.xlu0 %v687_v33, %s1195_s16  ;;  %754 = vrot.lane.b32.xlu1 %v686_v30, %s1195_s16  ;;  %s905_s16 = scalar_lea.sflag [#allocation4], %s255_s29 }
 0x34c   : > { %1008 = vmatmul.mubr.msk.bf16.vlgmr.msra.gmra.mrb[4].mxu1 %vm506_vm11, %v1006_v12 }
 0x34e   : > { %766 = vrot.lane.b32.xlu0 %v687_v33, %s1197_s18  ;;  %764 = vrot.lane.b32.xlu1 %v686_v30, %s1197_s18  ;;  %s1129_s18 = sshll.u32 %s1203_s17, 4  ;;  %s1130_s18 = int_to_ptr.vmem [resolvable:$false] %s1129_s18 }
 0x352   : > { %776 = vrot.lane.b32.xlu0 %v687_v33, %s1198_s19  ;;  %774 = vrot.lane.b32.xlu1 %v686_v30, %s1198_s19  ;;  %s1131_s19 = scalar_lea.vmem %s1130_s18, 512 }
 0x3b8   : > { %v747_v45 = vpop.permute.xlu0 %746  ;;  %v745_v46 = vpop.permute.xlu1 %744 }
 0x3b9   : > { %v748_v47 = vsel %vm354_vm3, %v745_v46, %v747_v45  ;;  %v749_v31 = vsel %vm354_vm3, %v747_v45, %v745_v46 }
 0x3ba   : > { %v750_v56 = vadd.f32 %v749_v31, %v1363_v39  ;;  %v751_v57 = vadd.f32 %v748_v47, %v1366_v40 }
 0x3bc   : > { %v757_v48 = vpop.permute.xlu0 %756  ;;  %v755_v51 = vpop.permute.xlu1 %754  ;;  %v752_v2 = vmax.f32 %v686_v30, %v750_v56  ;;  %v753_v35 = vmax.f32 %v687_v33, %v751_v57 }
 0x3bd   : > { %v758_v52 = vsel %vm373_vm4, %v755_v51, %v757_v48  ;;  %v759_v55 = vsel %vm373_vm4, %v757_v48, %v755_v51 }
 0x3be   : > { %v760_v58 = vadd.f32 %v759_v55, %v1371_v43  ;;  %v761_v59 = vadd.f32 %v758_v52, %v1374_v44 }
 0x3c0   : > { %v767_v60 = vpop.permute.xlu0 %766  ;;  %v765_v61 = vpop.permute.xlu1 %764  ;;  %v762_v4 = vmax.f32 %v752_v2, %v760_v58  ;;  %v763_v40 = vmax.f32 %v753_v35, %v761_v59 }
 0x3c1   : > { %v768_v34 = vsel %vm392_vm5, %v765_v61, %v767_v60  ;;  %v769_v62 = vsel %vm392_vm5, %v767_v60, %v765_v61 }
 0x3c2   : > { %v770_v3 = vadd.f32 %v768_v34, %v1389_v53  ;;  %v771_v39 = vadd.f32 %v769_v62, %v1392_v54  ;;  %v345_v54 = vld [vmem:[%s1684_s3] sm:$0xf] }
 0x3c3   : > { %1005 = vmatmul.mubr.msk.bf16.vlgmr.msra.gmra.mrb[4].mxu0 %vm506_vm11, %v345_v54 }
 0x3c4   : > { %v777_v5 = vpop.permute.xlu0 %776  ;;  %v775_v43 = vpop.permute.xlu1 %774  ;;  %v772_v7 = vmax.f32 %v762_v4, %v770_v3  ;;  %v773_v8 = vmax.f32 %v763_v40, %v771_v39  ;;  %869 = vmatprep.mubr.bf16.mxu0 %v1194_v0 }
 0x3c5   : > { %v778_v44 = vsel %vm411_vm6, %v775_v43, %v777_v5  ;;  %v779_v6 = vsel %vm411_vm6, %v777_v5, %v775_v43 }
 0x3c6   : > { %v780_v9 = vadd.f32 %v778_v44, %v1402_v63  ;;  %v781_v10 = vadd.f32 %v779_v6, %v1405_v1  ;;  %v551_v63 = vpop.f32.mrb[0].mxu1 }
 0x3c7   : > { %v553_v1 = vpop.f32.mrb[1].mxu1 }
 0x3c8   : > { %v782_v11 = vmax.f32 %v772_v7, %v780_v9  ;;  %v783_v53 = vmax.f32 %v773_v8, %v781_v10  ;;  %v555_v13 = vpop.f32.mrb[2].mxu1 }
 0x3c9   : > { %v556_v0 = vpop.f32.mrb[3].mxu1 }
 0x3ca   : > { %786 = vrot.lane.b32.xlu0 %v783_v53, %s1199_s10  ;;  %784 = vrot.lane.b32.xlu1 %v782_v11, %s1199_s10  ;;  %s996_s10 = sshll.u32 %s255_s29, 4 }
 0x3ce   : > { %796 = vrot.lane.b32.xlu0 %v783_v53, %s1200_s9  ;;  %794 = vrot.lane.b32.xlu1 %v782_v11, %s1200_s9  ;;  %s1018_s9 = sshll.u32 %s1260_s25, 8 }
 0x3cf   : > { %s1639_s15 = scalar_lea.hbm %s1687_s6, %s1018_s9 }
 0x3d2   : > { %806 = vrot.lane.b32.xlu0 %v783_v53, %s1201_s11  ;;  %804 = vrot.lane.b32.xlu1 %v782_v11, %s1201_s11  ;;  %s257_s11 = scalar_lea.vmem [#allocation5], %s996_s10 }
 0x3d6   : > { %816 = vrot.lane.b32.xlu0 %v783_v53, %s1202_s12  ;;  %814 = vrot.lane.b32.xlu1 %v782_v11, %s1202_s12  ;;  %s919_s12 = sshll.u32 %s257_s11, 4  ;;  %s1641_s12 = int_to_ptr.vmem [resolvable:$true] %s919_s12 }
 0x3d7   : > { %s1125_s25 = scalar_lea.vmem %s1641_s12, 256  ;;  %p1132_p2 = scmp.lt.s32.totalorder %s1641_s12, %s1130_s18 }
 0x3d8   : > { %p1126_p5 = scmp.ne.s32.totalorder %s1641_s12, %s1125_s25  ;;  %p1133_p3 = scmp.lt.s32.totalorder %s1131_s19, %s1125_s25 }
 0x3da   : > { %883 = vperm.xlu1 %1079, %v880_v14   ;;  %p1127_p10 = pnand %p1126_p5, %p1698_p9  ;;  %p1134_p4 = por %p1133_p3, %p1132_p2 }
 0x3dc   : > { %p1128_p12 = pneg %p1127_p10 }
 0x3de   : > { %p1135_p7 = pnand %p1134_p4, %p1128_p12 }
 0x41f   : > { %v735_v62 = vpop.f32.mrb[4].mxu1 }
 0x420   : > { %v737_v35 = vpop.f32.mrb[5].mxu1 }
 0x421   : > { %v739_v4 = vpop.f32.mrb[6].mxu1 }
 0x422   : > { %v740_v5 = vpop.f32.mrb[7].mxu1 }
 0x43c   : > { %v787_v15 = vpop.permute.xlu0 %786  ;;  %v785_v16 = vpop.permute.xlu1 %784 }
 0x43d   : > { %v788_v17 = vsel %vm430_vm7, %v785_v16, %v787_v15  ;;  %v789_v18 = vsel %vm430_vm7, %v787_v15, %v785_v16 }
 0x43e   : > { %v790_v25 = vadd.f32 %v789_v18, %v1427_v20  ;;  %v791_v28 = vadd.f32 %v788_v17, %v1430_v21 }
 0x440   : > { %v797_v19 = vpop.permute.xlu0 %796  ;;  %v795_v22 = vpop.permute.xlu1 %794  ;;  %v792_v45 = vmax.f32 %v782_v11, %v790_v25  ;;  %v793_v46 = vmax.f32 %v783_v53, %v791_v28 }
 0x441   : > { %v798_v23 = vsel %vm449_vm8, %v795_v22, %v797_v19  ;;  %v799_v24 = vsel %vm449_vm8, %v797_v19, %v795_v22 }
 0x442   : > { %v800_v29 = vadd.f32 %v799_v24, %v1439_v26  ;;  %v801_v30 = vadd.f32 %v798_v23, %v1442_v27 }
 0x444   : > { %v807_v33 = vpop.permute.xlu0 %806  ;;  %v805_v36 = vpop.permute.xlu1 %804  ;;  %v802_v31 = vmax.f32 %v792_v45, %v800_v29  ;;  %v803_v21 = vmax.f32 %v793_v46, %v801_v30 }
 0x445   : > { %v808_v37 = vsel %vm468_vm9, %v805_v36, %v807_v33  ;;  %v809_v42 = vsel %vm468_vm9, %v807_v33, %v805_v36 }
 0x446   : > { %v810_v47 = vadd.f32 %v808_v37, %v1453_v38  ;;  %v811_v20 = vadd.f32 %v809_v42, %v1456_v41 }
 0x448   : > { %v817_v48 = vpop.permute.xlu0 %816  ;;  %v815_v26 = vpop.permute.xlu1 %814  ;;  %v812_v52 = vmax.f32 %v802_v31, %v810_v47  ;;  %v813_v55 = vmax.f32 %v803_v21, %v811_v20 }
 0x449   : > { %v818_v27 = vsel %vm487_vm10, %v815_v26, %v817_v48  ;;  %v819_v51 = vsel %vm487_vm10, %v817_v48, %v815_v26 }
 0x44a   : > { %v820_v56 = vadd.f32 %v818_v27, %v1466_v49  ;;  %v821_v57 = vadd.f32 %v819_v51, %v1469_v50 }
 0x44c   : > { %v822_v58 = vmax.f32 %v812_v52, %v820_v56  ;;  %v823_v38 = vmax.f32 %v813_v55, %v821_v57 }
 0x44e   : > { %v826_v59 = vpack.c.bf16 %v822_v58, %v822_v58  ;;  %v827_v41 = vpack.c.bf16 %v823_v38, %v823_v38 }
 0x450   : > { %1010 = vmatprep.subr.msk.bf16.mxu0 %vm510_vm2, %v827_v41  ;;  %v832_v60 = vsel %vm510_vm2, %v826_v59, 0 }
 0x451   : > { %838 = vmatpush1.bf16.msra.mxu0 %v832_v60 }
 0x454   : > { %1011 = vmatmul.mubr.msk.bf16.vlgmr.msra.gmra.mrb[8].mxu0 %vm506_vm11, %v1009_v32 }
 0x459   : > { %v884_v44 = vpop.permute.xlu1 %883 }
 0x496   : > { %v601_v61 = vpop.f32.mrb[4].mxu0 }
 0x497   : > { %v602_v34 = vadd.f32 %v601_v61, %v551_v63  ;;  %v603_v49 = vpop.f32.mrb[5].mxu0 }
 0x498   : > { %v604_v50 = vadd.f32 %v603_v49, %v553_v1  ;;  %v605_v2 = vpop.f32.mrb[6].mxu0 }
 0x499   : > { %v742_v3 = vadd.f32 %v735_v62, %v602_v34  ;;  %v606_v39 = vpop.f32.mrb[7].mxu0 }
 0x49a   : > { %v743_v40 = vadd.f32 %v737_v35, %v604_v50 }
 0x527   : > { %v871_v43 = vpop.f32.mrb[8].mxu0 }
 0x528   : > { %v878_v6 = vadd.f32 %v871_v43, %v742_v3  ;;  %v873_v7 = vpop.f32.mrb[9].mxu0 }
 0x529   : > { %v879_v8 = vadd.f32 %v873_v7, %v743_v40  ;;  %v875_v9 = vpop.f32.mrb[10].mxu0 }
 0x52a   : > { %v886_v10 = vadd.f32 %v884_v44, %v878_v6  ;;  %v876_v11 = vpop.f32.mrb[11].mxu0 }
 0x52b   : > { %v887_v53 = vadd.f32 %v884_v44, %v879_v8 }
 0x52c   : > { %v888_v54 = vsub.f32 0.0, %v886_v10 }
 0x52d   : > { %v889_v12 = vsub.f32 0.0, %v887_v53 }
 0x52e   : > { %v890_v63 = vmul.f32 1.442695, %v888_v54 }
 0x52f   : > { %v892_v1 = vmul.f32 1.442695, %v889_v12 }
 0x530   : > { %1089 = vpow2.f32 %v890_v63 }
 0x531   : > { %1091 = vpow2.f32 %v892_v1 }
 0x53a   : > { %v1090_v13 = vpop.eup %1089 }
 0x53b   : > { %v1092_v14 = vpop.eup %1091  ;;  %v894_v0 = vadd.f32 1.0, %v1090_v13 }
 0x53c   : > { %v895_v15 = vadd.f32 1.0, %v1092_v14 }
 0x53d   : > { %1093 = vrcp.f32 %v894_v0 }
 0x53e   : > { %1095 = vrcp.f32 %v895_v15 }
 0x547   : > { %v1094_v16 = vpop.eup %1093 }
 0x548   : > { %v1096_v17 = vpop.eup %1095  ;;  %v900_v18 = vmul.f32 %v1094_v16, %v886_v10 }
 0x549   : > { %v901_v19 = vmul.f32 %v1096_v17, %v887_v53 }
 0x54a   : > { %902 = vst [vmem:[%s257_s11] sm:$0xff] %v900_v18 }
 0x54b   : > { %903 = vst [vmem:[%s257_s11 + $0x8] sm:$0xff] %v901_v19 }
 0x54c   : > { %1138 = shalt.err (!%p1135_p7)
}
 0x54d   : > { %s1139_s20 = scalar_lea.hbm %s1639_s15, 256  ;;  %s1143_s29 = scalar_lea.hbm %s1687_s6, 512 }
 0x54e   : > { %p1140_p8 = scmp.ne.s32.totalorder %s1639_s15, %s1139_s20  ;;  %p1144_p1 = scmp.lt.u32.totalorder %s1639_s15, %s1687_s6 }
 0x54f   : > { %p1145_p0 = scmp.lt.u32.totalorder %s1143_s29, %s1139_s20  ;;  %p1147_p5 = scmp.lt.u32.totalorder %s1139_s20, %s1639_s15 }
 0x550   : > { %p1141_p11 = pnand %p1140_p8, %p1698_p9 }
 0x551   : > { %p1146_p6 = por %p1145_p0, %p1144_p1 }
 0x552   : > { %p1142_p13 = pneg %p1141_p11 }
 0x553   : > { %p1148_p10 = por %p1147_p5, %p1146_p6 }
 0x555   : > { %p1149_p12 = pnand %p1148_p10, %p1142_p13 }
 0x557   : > { %1152 = shalt.err (!%p1149_p12)
}
 0x558   : > { %1023 = dma.vmem_to_hbm [thread:$0]  (%p1698_p9), %s1641_s12, 256, %s1639_s15, %s905_s16  }
 0x559 PF: > { %p1035_p2 = scmp.ge.s32.totalorder %s1191_s24, 2  ;;  %s931_s11 = sand.u32 1, %s1179_s21  }
 0x55a   : > { %p1699_p3 = scmp.ne.s32.totalorder %s1692_s8, 0  ;;  %s932_s13 = scalar_lea.sflag [#allocation4], %s931_s11 }
 0x55c   : > { %p1030_p4 = pnand %p1035_p2, %p1699_p3 }
 0x55e   : > { %1174 = dma.done.wait (!%p1030_p4), %s932_s13, 256  }
 0x55f   : > { %1176 = vsyncadd (!%p1030_p4), %s932_s13, 4294967040  ;;  %p17_p7 = scmp.ge.s32.totalorder %s1264_s27, 4   ;;  %s1700_s21 = smov %s1183_s22 }
 0x560   : > { %s1701_s22 = smov %s1187_s23  ;;  %s1702_s23 = smov %s1275_s30 }
 0x561   : > { %s1703_s24 = smov %s1264_s27  ;;  %19 = sbr.rel (!%p17_p7) target bundleno = 4 (0x4), region = 87 }
 0x568   :  { %937 = vsyncpa [#allocation3], 1 }
 0x569   :  { %939 = vsyncpa [#allocation3 + $0x1], 1 }
 0x56a   :  { %940 = vsyncpa [#allocation4], 1 }
 0x56b   :  { %942 = vsyncpa [#allocation4 + $0x1], 1 }

</bundles_post_ra>
